<compile_context>
chip_gen: v5e
topology: v5e:2x2
jax: 0.10.0
libtpu: 0.0.40
codegen_flags: <defaults>
</compile_context>

<pallas_src>
import jax
import jax.numpy as jnp
from jax.experimental import pallas as pl
from jax.experimental.pallas import tpu as pltpu


def _camera_kernel(params_ref, pts_ref, out_ref):
    """One (batch, N-tile) grid step.

    params_ref : SMEM f32[18] -> [R row-major(9), t(3), K row-major(4), pp(2)]
    pts_ref    : VMEM f32[1, 3, TN]  channel-major points (x / y / z rows)
    out_ref    : VMEM f32[1, 2, TN]  channel-major pixels (u / v rows)
    """
    p = pts_ref[0]                 # [3, TN]
    px = p[0:1, :]                 # [1, TN]  lane-dense
    py = p[1:2, :]
    pz = p[2:3, :]

    r00 = params_ref[0]; r01 = params_ref[1]; r02 = params_ref[2]
    r10 = params_ref[3]; r11 = params_ref[4]; r12 = params_ref[5]
    r20 = params_ref[6]; r21 = params_ref[7]; r22 = params_ref[8]
    tx = params_ref[9]; ty = params_ref[10]; tz = params_ref[11]
    k00 = params_ref[12]; k01 = params_ref[13]
    k10 = params_ref[14]; k11 = params_ref[15]
    ppx = params_ref[16]; ppy = params_ref[17]

    # camera_transform on homogeneous points (w == 1): cam = R @ p + t
    # deliberately kept as scalar-broadcast FMAs on the VPU (K=3 << MXU tile).
    cx = r00 * px + r01 * py + r02 * pz + tx
    cy = r10 * px + r11 * py + r12 * pz + ty
    cz = r20 * px + r21 * py + r22 * pz + tz

    # perspective divide: one exact reciprocal shared by both coordinates.
    # TODO(synk): no cz == 0 guard, matching the PyTorch original (inf/nan pass through).
    inv_z = 1.0 / cz
    ix = cx * inv_z
    iy = cy * inv_z

    # intrinsics: K @ img + principal_point; two lane-dense row stores.
    out_ref[0, 0:1, :] = k00 * ix + k01 * iy + ppx
    out_ref[0, 1:2, :] = k10 * ix + k11 * iy + ppy


def camera_forward(points, rotation, translation, mat, principal_point, *, tile_n=2048):
    """points [B,N,3]; rotation [1,3,3]; translation [1,3]; mat [1,2,2]; pp [1,2].

    Returns projected pixels [B, N, 2] (same as the PyTorch module).
    """
    B, N, _ = points.shape

    # Lane-dense tile along N: multiple of 128, capped by the rounded-up N.
    n_rounded = pl.cdiv(N, 128) * 128
    tn = int(min(int(tile_n), n_rounded))
    n_tiles = pl.cdiv(n_rounded, tn)
    n_pad = n_tiles * tn

    pts = points.astype(jnp.float32)
    if n_pad != N:
        # pad with 1.0 so padded lanes have z == 1 (no inf/nan); sliced away below.
        pts = jnp.pad(pts, ((0, 0), (0, n_pad - N), (0, 0)), constant_values=1.0)
    pts_t = jnp.transpose(pts, (0, 2, 1))            # [B, 3, n_pad] channel-major

    # 18 shared camera scalars -> single SMEM-resident vector (no per-batch HBM copies).
    params = jnp.concatenate([
        jnp.reshape(rotation, (-1,)),                # 9  (row-major R)
        jnp.reshape(translation, (-1,)),             # 3
        jnp.reshape(mat, (-1,)),                     # 4  (row-major K)
        jnp.reshape(principal_point, (-1,)),         # 2
    ]).astype(jnp.float32)

    out_t = pl.pallas_call(
        _camera_kernel,
        out_shape=jax.ShapeDtypeStruct((B, 2, n_pad), jnp.float32),
        grid=(B, n_tiles),
        in_specs=[
            pl.BlockSpec(memory_space=pltpu.MemorySpace.SMEM),      # camera scalars
            pl.BlockSpec((1, 3, tn), lambda b, n: (b, 0, n)),       # points tile
        ],
        out_specs=pl.BlockSpec((1, 2, tn), lambda b, n: (b, 0, n)),
        compiler_params=pltpu.CompilerParams(
            dimension_semantics=("parallel", "parallel")),
    )(params, pts_t)

    return jnp.transpose(out_t, (0, 2, 1))[:, :N, :]   # back to [B, N, 2]


def camera_reference(points, rotation, translation, mat, principal_point):
    """Pure-JAX transcription of the PyTorch forward (for verification)."""
    B = points.shape[0]
    R = jnp.broadcast_to(rotation, (B, 3, 3))
    t = jnp.broadcast_to(translation, (B, 3))
    top = jnp.concatenate([R, t[:, :, None]], axis=2)                      # [B,3,4]
    bottom = jnp.broadcast_to(jnp.array([[[0.0, 0.0, 0.0, 1.0]]]), (B, 1, 4))
    T = jnp.concatenate([top, bottom], axis=1)                             # [B,4,4]
    hp = jnp.concatenate([points, jnp.ones_like(points[..., :1])], axis=-1)
    proj = jnp.einsum("bki,bji->bjk", T, hp)
    img = proj[:, :, :2] / proj[:, :, 2:3]
    img = jnp.einsum("bki,bji->bjk", jnp.broadcast_to(mat, (B, 2, 2)), img)
    img = img + jnp.broadcast_to(principal_point, (B, 2))[:, None, :]
    return img


if __name__ == "__main__":
    B, N = 2, 200
    key = jax.random.PRNGKey(0)

    # Deterministic "module parameters" (Camera.__init__ defaults).
    focal_length = 5000.0
    principal_point_val = 0.5
    mat = jnp.zeros((1, 2, 2), jnp.float32)
    mat = mat.at[:, 0, 0].set(focal_length).at[:, 1, 1].set(focal_length)
    pp = jnp.full((1, 2), principal_point_val, jnp.float32)
    rotation = jnp.eye(3, dtype=jnp.float32)[None]        # [1, 3, 3]
    translation = jnp.zeros((1, 3), jnp.float32)          # [1, 3]

    # Example input points; push z away from 0 so the perspective divide is benign.
    points = jax.random.normal(key, (B, N, 3), jnp.float32)
    points = points.at[..., 2].add(3.0)

    ref = camera_reference(points, rotation, translation, mat, pp)

    # Default tiling (single N tile for this small N).
    out = camera_forward(points, rotation, translation, mat, pp)
    out = jax.block_until_ready(out)
    assert out.shape == (B, N, 2)
    assert jnp.allclose(out, ref, atol=1e-4, rtol=1e-4), "mismatch vs reference (default tile)"

    # Small tile to exercise multi-tile grid + tail padding path.
    out_small = camera_forward(points, rotation, translation, mat, pp, tile_n=128)
    out_small = jax.block_until_ready(out_small)
    assert jnp.allclose(out_small, ref, atol=1e-4, rtol=1e-4), "mismatch vs reference (tiled)"

    print("KERNEL_OK")
</pallas_src>

<mosaic_0001>
module attributes {stable_mosaic.version = 11 : i64} {
  func.func @_camera_kernel(%arg0: i32, %arg1: i32, %arg2: memref<18xf32, #tpu.memory_space<smem>>, %arg3: memref<1x3x256xf32, #tpu.memory_space<vmem>>, %arg4: memref<1x2x256xf32, #tpu.memory_space<vmem>>) attributes {dimension_semantics = [#tpu.dimension_semantics<parallel>, #tpu.dimension_semantics<parallel>], iteration_bounds = array<i64: 2, 1>, scalar_prefetch = 0 : i64, scratch_operands = 0 : i64, tpu.core_type = #tpu.core_type<tc>, window_params = [{transform_indices = @transform_0, window_bounds = array<i64: 18>}, {transform_indices = @transform_1, window_bounds = array<i64: 1, 3, 256>}, {transform_indices = @transform_2, window_bounds = array<i64: 1, 2, 256>}]} {
    %c0 = arith.constant 0 : index
    %c0_0 = arith.constant 0 : index
    %c0_1 = arith.constant 0 : index
    %0 = vector.load %arg3[%c0, %c0_0, %c0_1] : memref<1x3x256xf32, #tpu.memory_space<vmem>>, vector<1x3x256xf32>
    %1 = vector.shape_cast %0 : vector<1x3x256xf32> to vector<3x256xf32>
    %2 = vector.extract_strided_slice %1 {offsets = [0, 0], sizes = [1, 256], strides = [1, 1]} : vector<3x256xf32> to vector<1x256xf32>
    %3 = vector.extract_strided_slice %1 {offsets = [1, 0], sizes = [1, 256], strides = [1, 1]} : vector<3x256xf32> to vector<1x256xf32>
    %4 = vector.extract_strided_slice %1 {offsets = [2, 0], sizes = [1, 256], strides = [1, 1]} : vector<3x256xf32> to vector<1x256xf32>
    %c0_2 = arith.constant 0 : index
    %5 = memref.load %arg2[%c0_2] : memref<18xf32, #tpu.memory_space<smem>>
    %c1 = arith.constant 1 : index
    %6 = memref.load %arg2[%c1] : memref<18xf32, #tpu.memory_space<smem>>
    %c2 = arith.constant 2 : index
    %7 = memref.load %arg2[%c2] : memref<18xf32, #tpu.memory_space<smem>>
    %c3 = arith.constant 3 : index
    %8 = memref.load %arg2[%c3] : memref<18xf32, #tpu.memory_space<smem>>
    %c4 = arith.constant 4 : index
    %9 = memref.load %arg2[%c4] : memref<18xf32, #tpu.memory_space<smem>>
    %c5 = arith.constant 5 : index
    %10 = memref.load %arg2[%c5] : memref<18xf32, #tpu.memory_space<smem>>
    %c6 = arith.constant 6 : index
    %11 = memref.load %arg2[%c6] : memref<18xf32, #tpu.memory_space<smem>>
    %c7 = arith.constant 7 : index
    %12 = memref.load %arg2[%c7] : memref<18xf32, #tpu.memory_space<smem>>
    %c8 = arith.constant 8 : index
    %13 = memref.load %arg2[%c8] : memref<18xf32, #tpu.memory_space<smem>>
    %c9 = arith.constant 9 : index
    %14 = memref.load %arg2[%c9] : memref<18xf32, #tpu.memory_space<smem>>
    %c10 = arith.constant 10 : index
    %15 = memref.load %arg2[%c10] : memref<18xf32, #tpu.memory_space<smem>>
    %c11 = arith.constant 11 : index
    %16 = memref.load %arg2[%c11] : memref<18xf32, #tpu.memory_space<smem>>
    %c12 = arith.constant 12 : index
    %17 = memref.load %arg2[%c12] : memref<18xf32, #tpu.memory_space<smem>>
    %c13 = arith.constant 13 : index
    %18 = memref.load %arg2[%c13] : memref<18xf32, #tpu.memory_space<smem>>
    %c14 = arith.constant 14 : index
    %19 = memref.load %arg2[%c14] : memref<18xf32, #tpu.memory_space<smem>>
    %c15 = arith.constant 15 : index
    %20 = memref.load %arg2[%c15] : memref<18xf32, #tpu.memory_space<smem>>
    %c16 = arith.constant 16 : index
    %21 = memref.load %arg2[%c16] : memref<18xf32, #tpu.memory_space<smem>>
    %c17 = arith.constant 17 : index
    %22 = memref.load %arg2[%c17] : memref<18xf32, #tpu.memory_space<smem>>
    %23 = vector.broadcast %5 : f32 to vector<1x256xf32>
    %24 = arith.mulf %23, %2 : vector<1x256xf32>
    %25 = vector.broadcast %6 : f32 to vector<1x256xf32>
    %26 = arith.mulf %25, %3 : vector<1x256xf32>
    %27 = arith.addf %24, %26 : vector<1x256xf32>
    %28 = vector.broadcast %7 : f32 to vector<1x256xf32>
    %29 = arith.mulf %28, %4 : vector<1x256xf32>
    %30 = arith.addf %27, %29 : vector<1x256xf32>
    %31 = vector.broadcast %14 : f32 to vector<1x256xf32>
    %32 = arith.addf %30, %31 : vector<1x256xf32>
    %33 = vector.broadcast %8 : f32 to vector<1x256xf32>
    %34 = arith.mulf %33, %2 : vector<1x256xf32>
    %35 = vector.broadcast %9 : f32 to vector<1x256xf32>
    %36 = arith.mulf %35, %3 : vector<1x256xf32>
    %37 = arith.addf %34, %36 : vector<1x256xf32>
    %38 = vector.broadcast %10 : f32 to vector<1x256xf32>
    %39 = arith.mulf %38, %4 : vector<1x256xf32>
    %40 = arith.addf %37, %39 : vector<1x256xf32>
    %41 = vector.broadcast %15 : f32 to vector<1x256xf32>
    %42 = arith.addf %40, %41 : vector<1x256xf32>
    %43 = vector.broadcast %11 : f32 to vector<1x256xf32>
    %44 = arith.mulf %43, %2 : vector<1x256xf32>
    %45 = vector.broadcast %12 : f32 to vector<1x256xf32>
    %46 = arith.mulf %45, %3 : vector<1x256xf32>
    %47 = arith.addf %44, %46 : vector<1x256xf32>
    %48 = vector.broadcast %13 : f32 to vector<1x256xf32>
    %49 = arith.mulf %48, %4 : vector<1x256xf32>
    %50 = arith.addf %47, %49 : vector<1x256xf32>
    %51 = vector.broadcast %16 : f32 to vector<1x256xf32>
    %52 = arith.addf %50, %51 : vector<1x256xf32>
    %cst = arith.constant 1.000000e+00 : f32
    %53 = vector.broadcast %cst : f32 to vector<1x256xf32>
    %54 = arith.divf %53, %52 : vector<1x256xf32>
    %55 = arith.mulf %32, %54 : vector<1x256xf32>
    %56 = arith.mulf %42, %54 : vector<1x256xf32>
    %57 = vector.broadcast %17 : f32 to vector<1x256xf32>
    %58 = arith.mulf %57, %55 : vector<1x256xf32>
    %59 = vector.broadcast %18 : f32 to vector<1x256xf32>
    %60 = arith.mulf %59, %56 : vector<1x256xf32>
    %61 = arith.addf %58, %60 : vector<1x256xf32>
    %62 = vector.broadcast %21 : f32 to vector<1x256xf32>
    %63 = arith.addf %61, %62 : vector<1x256xf32>
    %c0_3 = arith.constant 0 : index
    %c0_4 = arith.constant 0 : index
    %c0_5 = arith.constant 0 : index
    %64 = vector.load %arg4[%c0_3, %c0_4, %c0_5] : memref<1x2x256xf32, #tpu.memory_space<vmem>>, vector<1x1x256xf32>
    %65 = vector.shape_cast %64 : vector<1x1x256xf32> to vector<1x256xf32>
    %66 = vector.shape_cast %63 : vector<1x256xf32> to vector<1x1x256xf32>
    tpu.vector_store %arg4[%c0_3, %c0_4, %c0_5], %66 {strides = array<i32>} : memref<1x2x256xf32, #tpu.memory_space<vmem>>, vector<1x1x256xf32>,
    %67 = vector.broadcast %19 : f32 to vector<1x256xf32>
    %68 = arith.mulf %67, %55 : vector<1x256xf32>
    %69 = vector.broadcast %20 : f32 to vector<1x256xf32>
    %70 = arith.mulf %69, %56 : vector<1x256xf32>
    %71 = arith.addf %68, %70 : vector<1x256xf32>
    %72 = vector.broadcast %22 : f32 to vector<1x256xf32>
    %73 = arith.addf %71, %72 : vector<1x256xf32>
    %c0_6 = arith.constant 0 : index
    %c1_7 = arith.constant 1 : index
    %c0_8 = arith.constant 0 : index
    %74 = vector.load %arg4[%c0_6, %c1_7, %c0_8] : memref<1x2x256xf32, #tpu.memory_space<vmem>>, vector<1x1x256xf32>
    %75 = vector.shape_cast %74 : vector<1x1x256xf32> to vector<1x256xf32>
    %76 = vector.shape_cast %73 : vector<1x256xf32> to vector<1x1x256xf32>
    tpu.vector_store %arg4[%c0_6, %c1_7, %c0_8], %76 {strides = array<i32>} : memref<1x2x256xf32, #tpu.memory_space<vmem>>, vector<1x1x256xf32>,
    return
  }
  func.func @transform_0(%arg0: i32, %arg1: i32) -> i32 {
    %c0_i32 = arith.constant 0 : i32
    %c0_i32_0 = arith.constant 0 : i32
    return %c0_i32 : i32
  }
  func.func @transform_1(%arg0: i32, %arg1: i32) -> (i32, i32, i32) {
    %c0_i32 = arith.constant 0 : i32
    %c0_i32_0 = arith.constant 0 : i32
    return %arg0, %c0_i32, %arg1 : i32, i32, i32
  }
  func.func @transform_2(%arg0: i32, %arg1: i32) -> (i32, i32, i32) {
    %c0_i32 = arith.constant 0 : i32
    %c0_i32_0 = arith.constant 0 : i32
    return %arg0, %c0_i32, %arg1 : i32, i32, i32
  }
}

</mosaic_0001>

<bundles_post_ra>
// kernel: tpu_custom_call.1
= control target key start
LH: loop header
LB: loop body
LE: loop exit
PB: predicated region body
PF: predicated region fallthrough
CT: control target
= control target key end

     0   :  { %7 = vsyncpa [#allocation4], 0  ;;  %s757_s0 = inlined_call_operand.vmem [shape: f32[18], index: 0, kind: input, shape index: {}]   ;;  %s758_s1 = inlined_call_operand.vmem [shape: f32[2,3,256], index: 1, kind: input, shape index: {}]   ;;  %s759_s2 = inlined_call_operand.hbm [shape: f32[2,2,256], index: 2, kind: output, shape index: {}]  }
   0x1   :  { %8 = vsyncpa [#allocation3], 0 }
   0x2   :  { %10 = vsyncpa [#allocation3 + $0x1], 0  ;;  %s638_s9 = smov 0   ;;  %s640_s10 = smov 0  }
   0x3   :  { %s642_s11 = smov 0   ;;  %s644_s12 = smov 0  }
   0x4   :  { %s646_s13 = smov 0   ;;  %s648_s14 = smov 0  }
   0x5 LB: > { %s414_s15 = sadd.s32 4294967295, %s620_s14   ;;  %s415_s16 = sadd.s32 4294967294, %s620_s14   ;;  %s620_s14 = sphi %s648_s14, %s16_s14   ;;  %s616_s13 = sphi %s646_s13, %s766_s13   ;;  %s612_s12 = sphi %s644_s12, %s765_s12   ;;  %s608_s11 = sphi %s642_s11, %s764_s11   ;;  %s604_s10 = sphi %s640_s10, %s763_s10   ;;  %s600_s9 = sphi %s638_s9, %s762_s9  }
   0x6   : > { %s28_s17 = sadd.s32 1, %s616_s13  ;;  %s86_s18 = sadd.s32 1, %s608_s11 }
   0x7   : > { %p30_p0 = scmp.ge.s32.totalorder %s28_s17, 2  ;;  %p96_p1 = scmp.ne.s32.totalorder %s608_s11, %s604_s10 }
   0x8   : > { %p97_p2 = scmp.eq.s32.totalorder %s414_s15, 1  ;;  %p102_p3 = scmp.ne.s32.totalorder %s604_s10, %s600_s9 }
   0x9   : > { %s768_s17 = smov (%p30_p0, %s28_s17), 0  ;;  %p103_p5 = scmp.eq.s32.totalorder %s415_s16, 1 }
   0xa   : > { %p678_p4 = por %p97_p2, %p96_p1  ;;  %s81_s20 = ssub.s32 %s616_s13, %s768_s17 }
   0xb   : > { %p416_p6 = scmp.ge.s32.totalorder %s620_s14, 1  ;;  %p84_p7 = scmp.eq.s32.totalorder %s81_s20, 0 }
   0xc   : > { %p685_p8 = por %p103_p5, %p102_p3  ;;  %p110_p9 = scmp.lt.s32.totalorder %s620_s14, 3 }
   0xd   : > { %s691_s22 = scalar_select %p84_p7, %s608_s11, %s86_s18  }
   0xe   : > { %p111_p10 = pnand %p416_p6, %p110_p9  ;;  %p469_p11 = scmp.eq.s32.totalorder %s414_s15, 0 }
   0xf   : > { %s122_s25 = sshll.u32 %s757_s0, 4  ;;  %s622_s26 = smov [#allocation2]   ;;  %s123_s25 = int_to_ptr.vmem [resolvable:$true] %s122_s25 }
  0x10   : > { %p461_p12 = pneg %p111_p10  ;;  %148 = sbr.rel (%p111_p10) target bundleno = 77 (0x4d), region = 28 }
  0x12   : > { %p462_p13 = pnand %p469_p11, %p461_p12 }
  0x14   : > { %464 = dma.vmem_to_smem (!%p462_p13), %s123_s25, 16, %s622_s26, [#allocation4]  }
  0x15   : > { %591 = dma.done.wait (%p469_p11), [#allocation4], 16  }
  0x16   : > { %593 = vsyncadd (%p469_p11), [#allocation4], 4294967280 }
  0x17   : > { %155 = sfence }
  0x18   : > { %p177_p0 = scmp.lt.s32.totalorder %s612_s12, 1  ;;  %s698_s28 = sld [smem:[#allocation2]]  ;;  %v289_v60 = vlaneseq  ;;  %vm286_vm4 = vcmask 1040384  }
  0x19   : > { %s424_s30 = sld [smem:[#allocation2 + $0x1]]  ;;  %s454_s6 = sshll.u32 %s612_s12, 2 }
  0x1a   : > { %s178_s27 = scalar_select %p177_p0, %s612_s12, 1  ;;  %vm291_vm5 = vcmp.lt.s32.totalorder %v289_v60, 256 }
  0x1b   : > { %s429_s3 = sld [smem:[#allocation2 + $0x6]] }
  0x1c   : > { %s453_s29 = sshll.u32 %s178_s27, 3  ;;  %s430_s4 = sld [smem:[#allocation2 + $0x7]] }
  0x1d   : > { %s184_s7 = scalar_lea.vmem %s758_s1, %s453_s29  ;;  %s431_s8 = sld [smem:[#allocation2 + $0x8]] }
  0x1e   : > { %s427_s15 = sld [smem:[#allocation2 + $0x4]]  ;;  %v187_v0 = vld [vmem:[%s184_s7] sm:$0x77]  ;;  %v206_v14 = vstv %s698_s28 }
  0x1f   : > { %s425_s16 = sld [smem:[#allocation2 + $0x2]]  ;;  %v208_v7 = vstv %s424_s30  ;;  %v207_v21 = vmul.f32 %v206_v14, %v187_v0 }
  0x20   : > { %s434_s18 = sld [smem:[#allocation2 + $0xb]]  ;;  %v209_v12 = vmul.f32 %v208_v7, %v187_v0 }
  0x21   : > { %s426_s20 = sld [smem:[#allocation2 + $0x3]]  ;;  %v242_v1 = vstv %s429_s3 }
  0x22   : > { %s428_s23 = sld [smem:[#allocation2 + $0x5]]  ;;  %v244_v2 = vstv %s430_s4  ;;  %v243_v3 = vmul.f32 %v242_v1, %v187_v0  ;;  %v441_v22 = vrot.slane %v209_v12, 9  ;;  %s173_s4 = sand.u32 1, %s604_s10  }
  0x23   : > { %v245_v4 = vmul.f32 %v244_v2, %v187_v0  ;;  %v251_v5 = vstv %s431_s8  ;;  %s432_s24 = sld [smem:[#allocation2 + $0x9]]  ;;  %s421_s5 = sshll.u32 %s173_s4, 2 }
  0x24   : > { %v252_v6 = vmul.f32 %v251_v5, %v187_v0  ;;  %v226_v9 = vstv %s427_s15  ;;  %s433_s25 = sld [smem:[#allocation2 + $0xa]]  ;;  %v214_v27 = vadd.f32 %v441_v22, %v207_v21  ;;  %s321_s15 = scalar_lea.hbm %s759_s2, %s454_s6 }
  0x25   : > { %v445_v8 = vrot.slane %v245_v4, 9  ;;  %v215_v15 = vstv %s425_s16  ;;  %v227_v16 = vmul.f32 %v226_v9, %v187_v0  ;;  %s704_s26 = sld [smem:[#allocation2 + $0xc]]  ;;  %s175_s16 = scalar_lea.vmem [#allocation5], %s421_s5 }
  0x26   : > { %v446_v10 = vrot.slane %v252_v6, 10  ;;  %v258_v13 = vstv %s434_s18  ;;  %v216_v23 = vmul.f32 %v215_v15, %v187_v0  ;;  %s706_s27 = sld [smem:[#allocation2 + $0xd]]  ;;  %s323_s18 = sshll.u32 %s175_s16, 4  ;;  %s324_s18 = int_to_ptr.vmem [resolvable:$true] %s323_s18 }
  0x27   : > { %v250_v11 = vadd.f32 %v445_v8, %v243_v3  ;;  %v224_v18 = vstv %s426_s20  ;;  %v443_v25 = vrot.slane %v227_v16, 9  ;;  %s708_s28 = sld [smem:[#allocation2 + $0xe]]  ;;  %s325_s12 = sshll.u32 %s321_s15, 4  ;;  %s326_s12 = int_to_ptr.hbm [resolvable:$true] %s325_s12 }
  0x28   : > { %v233_v19 = vstv %s428_s23  ;;  %v225_v24 = vmul.f32 %v224_v18, %v187_v0  ;;  %v442_v28 = vrot.slane %v216_v23, 10  ;;  %s438_s29 = sld [smem:[#allocation2 + $0xf]]  ;;  %s308_s20 = scalar_lea.sflag [#allocation3], %s173_s4 }
  0x29   : > { %v257_v17 = vadd.f32 %v446_v10, %v250_v11  ;;  %v234_v26 = vmul.f32 %v233_v19, %v187_v0  ;;  %v222_v38 = vstv %s432_s24  ;;  %s710_s30 = sld [smem:[#allocation2 + $0x10]]  ;;  %s552_s23 = sshra.s32 %s326_s12, 4  ;;  %s553_s23 = int_to_ptr.hbm [resolvable:$true] %s552_s23 }
  0x2a   : > { %v232_v29 = vadd.f32 %v443_v25, %v225_v24  ;;  %v221_v33 = vadd.f32 %v442_v28, %v214_v27  ;;  %v240_v39 = vstv %s433_s25  ;;  %s440_s3 = sld [smem:[#allocation2 + $0x11]]  ;;  %s554_s24 = scalar_lea.hbm %s553_s23, 4 }
  0x2b   : > { %v259_v20 = vadd.f32 %v258_v13, %v257_v17  ;;  %v444_v30 = vrot.slane %v234_v26, 10  ;;  %v277_v46 = vstv %s704_s26  ;;  %p555_p1 = scmp.ne.s32.totalorder %s553_s23, %s554_s24  ;;  %p559_p5 = scmp.lt.s32.totalorder %s553_s23, %s759_s2 }
  0x2c   : > { %v223_v42 = vadd.f32 %v222_v38, %v221_v33  ;;  %v279_v48 = vstv %s706_s27  ;;  %s558_s27 = scalar_lea.hbm %s759_s2, 8 }
  0x2d   : > { %521 = vrcp.f32 %v259_v20  ;;  %v239_v34 = vadd.f32 %v444_v30, %v232_v29  ;;  %v271_v35 = vand.u32 2147483648, %v259_v20  ;;  %vm265_vm0 = vweird.f32 %v259_v20  ;;  %p556_p2 = pnand %p555_p1, %p678_p4  ;;  %p560_p6 = scmp.lt.s32.totalorder %s558_s27, %s554_s24 }
  0x2e   : > { %v269_v37 = vand.u32 2147483647, %v259_v20  ;;  %v294_v49 = vstv %s708_s28  ;;  %v296_v50 = vstv %s438_s29 }
  0x2f   : > { %v272_v41 = vor.u32 1.1754944e-38, %v271_v35  ;;  %v241_v43 = vadd.f32 %v240_v39, %v239_v34  ;;  %v282_v57 = vstv %s710_s30  ;;  %p557_p3 = pneg %p556_p2  ;;  %p561_p7 = por %p560_p6, %p559_p5 }
  0x30   : > { %vm270_vm3 = vcmp.eq.f32.partialorder %v269_v37, 8.507059e+37  ;;  %v299_v58 = vstv %s440_s3 }
  0x31   : > { %p562_p9 = pnand %p561_p7, %p557_p3 }
  0x33   : > { %v522_v31 = vpop.eup %521 }
  0x34   : > { %v261_v32 = vmul.f32 %v522_v31, %v259_v20  ;;  %vm266_vm1 = vweird.f32 %v522_v31 }
  0x35   : > { %vm267_vm2 = vmor %vm265_vm0, %vm266_vm1 }
  0x36   : > { %v262_v36 = vsub.f32 1.0, %v261_v32 }
  0x38   : > { %v263_v40 = vmul.f32 %v522_v31, %v262_v36 }
  0x3a   : > { %v264_v44 = vadd.f32 %v522_v31, %v263_v40 }
  0x3c   : > { %v268_v45 = vsel %vm267_vm2, %v522_v31, %v264_v44 }
  0x3d   : > { %v273_v47 = vsel %vm270_vm3, %v272_v41, %v268_v45 }
  0x3e   : > { %v275_v51 = vmul.f32 %v273_v47, %v223_v42  ;;  %v276_v52 = vmul.f32 %v273_v47, %v241_v43 }
  0x40   : > { %v278_v53 = vmul.f32 %v277_v46, %v275_v51  ;;  %v280_v54 = vmul.f32 %v279_v48, %v276_v52  ;;  %v295_v55 = vmul.f32 %v294_v49, %v275_v51  ;;  %v297_v56 = vmul.f32 %v296_v50, %v276_v52 }
  0x42   : > { %v281_v59 = vadd.f32 %v280_v54, %v278_v53  ;;  %v298_v61 = vadd.f32 %v297_v56, %v295_v55 }
  0x44   : > { %v283_v62 = vadd.f32 %v282_v57, %v281_v59  ;;  %v300_v63 = vadd.f32 %v299_v58, %v298_v61 }
  0x46   : > { %v285_v0 = vrot.slane %v283_v62, 3  ;;  %v302_v1 = vrot.slane %v300_v63, 3 }
  0x48   : > { %v287_v2 = vsel %vm286_vm4, %v283_v62, %v285_v0  ;;  %v303_v3 = vsel %vm286_vm4, %v300_v63, %v302_v1 }
  0x49   : > { %293 = vst.msk [vmem:[%s175_s16] ss:$2 sm:$0x3] %vm291_vm5, %v287_v2 }
  0x4a   : > { %447 = vst.msk [vmem:[%s175_s16 + $0x1] ss:$2 sm:$0x3] %vm291_vm5, %v303_v3 }
  0x4b   : > { %565 = shalt.err (!%p562_p9)
}
  0x4c   : > { %459 = dma.vmem_to_hbm [thread:$0]  (%p678_p4), %s324_s18, 64, %s326_s12, %s308_s20  }
  0x4d PF: > { %p471_p10 = scmp.ge.s32.totalorder %s620_s14, 2  ;;  %s337_s30 = sand.u32 1, %s600_s9  }
  0x4e   : > { %s338_s3 = scalar_lea.sflag [#allocation3], %s337_s30 }
  0x4f   : > { %p466_p11 = pnand %p471_p10, %p685_p8 }
  0x51   : > { %p467_p12 = pneg %p466_p11 }
  0x53   : > { %595 = dma.done.wait (%p467_p12), %s338_s3, 64  }
  0x54   : > { %597 = vsyncadd (%p467_p12), %s338_s3, 4294967232  ;;  %s16_s14 = sadd.s32 1, %s620_s14   ;;  %s762_s9 = smov %s604_s10 }
  0x55   : > { %p13_p13 = scmp.ge.s32.totalorder %s16_s14, 4   ;;  %s763_s10 = smov %s608_s11 }
  0x56   : > { %s764_s11 = smov %s691_s22  ;;  %s765_s12 = smov %s616_s13 }
  0x57   : > { %s766_s13 = smov %s768_s17  ;;  %15 = sbr.rel (!%p13_p13) target bundleno = 5 (0x5), region = 69 }
  0x5c   :  { %344 = vsyncpa [#allocation3], 1 }
  0x5d   :  { %346 = vsyncpa [#allocation3 + $0x1], 1 }
  0x5e   :  { %347 = vsyncpa [#allocation4], 1 }
  0x5f   :  { %349 = vsyncpa [#allocation4 + $0x1], 1 }

</bundles_post_ra>
